<compile_context>
chip_gen: v5e
topology: v5e:2x2
jax: 0.10.0
libtpu: 0.0.40
codegen_flags: <defaults>
</compile_context>

<pallas_src>
import jax
import jax.numpy as jnp
from jax.experimental import pallas as pl
from jax.experimental.pallas import tpu as pltpu


# ---------------------------------------------------------------------------
# Kernels
# ---------------------------------------------------------------------------

def _value_head_o1_kernel(x_ref, w_ref, b_ref, o_ref):
    """out_channels == 1: MXU matvec against the (C,1) column + SMEM bias + tanh."""
    acc = jnp.dot(x_ref[...], w_ref[...], preferred_element_type=jnp.float32)  # (TB, 1)
    acc = acc + b_ref[0, 0]                           # scalar bias from SMEM
    o_ref[...] = jnp.tanh(acc).astype(o_ref.dtype)    # EUP tanh


def _value_head_kernel(x_ref, w_ref, b_ref, o_ref):
    """General path (out_channels padded to a multiple of 128): MXU + bias + tanh."""
    acc = jnp.dot(x_ref[...], w_ref[...], preferred_element_type=jnp.float32)
    acc = acc + b_ref[...]
    o_ref[...] = jnp.tanh(acc).astype(o_ref.dtype)


# ---------------------------------------------------------------------------
# Wrapper
# ---------------------------------------------------------------------------

def _round_up(n, m):
    return ((n + m - 1) // m) * m


def _choose_block_b(B, C):
    """Batch tile size.

    Sized by bytes: ~2 MiB of x per pipeline buffer (so double-buffered x is
    ~4 MiB), rounded to a multiple of 8 sublanes.  Additionally capped at
    ceil(B/2) (rounded to 8) so batches that could use both v7x TensorCores
    always get >= 2 grid steps under dimension_semantics=("parallel",).
    """
    per_buffer_bytes = 2 * 1024 * 1024
    tb = per_buffer_bytes // max(1, C * 4)
    tb = max(8, (tb // 8) * 8)

    if B > 8:
        half = _round_up(-(-B // 2), 8)        # ceil(B/2) rounded up to 8
        tb = min(tb, max(8, half))

    tb = min(tb, _round_up(B, 8))              # never bigger than the batch
    return max(8, (tb // 8) * 8)


def _vmem_limit_bytes(block_b, C, out_w):
    # double-buffered x + double-buffered output + resident weights/bias + slack
    need = (2 * block_b * C * 4) + (2 * block_b * out_w * 4) + (C * out_w * 4) + (2 << 20)
    return int(min(48 * 1024 * 1024, max(32 * 1024 * 1024, need)))


def value_head_forward(x, w_t, b, *, block_b=None):
    """x: (B, C) f32, w_t: (C, O) f32, b: (1, O) f32  ->  (B, O) f32."""
    B, C = x.shape
    O = w_t.shape[1]

    if block_b is None:
        block_b = _choose_block_b(B, C)
    else:
        block_b = max(8, (int(block_b) // 8) * 8)
        block_b = min(block_b, _round_up(B, 8))

    # No batch padding: the grid covers B with a (possibly partial) tail block.
    # Edge-block input rows are garbage but row-independent; edge-block output
    # rows beyond B are masked off by Pallas.
    grid = (pl.cdiv(B, block_b),)

    cost = pl.CostEstimate(
        flops=2 * B * C * O,
        transcendentals=B * O,
        bytes_accessed=(B * C + C * O + O + B * O) * 4,
    )

    if O == 1:
        out_w = 1
        cparams = pltpu.CompilerParams(
            dimension_semantics=("parallel",),       # shard batch tiles across TCs (v7x)
            vmem_limit_bytes=_vmem_limit_bytes(block_b, C, out_w),
        )
        w_col = w_t.reshape(C, 1)                    # (C, 1) column, resident in VMEM
        b_smem = b.reshape(1, 1)
        out = pl.pallas_call(
            _value_head_o1_kernel,
            out_shape=jax.ShapeDtypeStruct((B, 1), jnp.float32),
            grid=grid,
            in_specs=[
                pl.BlockSpec((block_b, C), lambda i: (i, 0)),          # x tiles
                pl.BlockSpec((C, 1), lambda i: (0, 0)),                # weight column
                pl.BlockSpec(memory_space=pltpu.MemorySpace.SMEM),     # scalar bias
            ],
            out_specs=pl.BlockSpec((block_b, 1), lambda i: (i, 0)),
            compiler_params=cparams,
            cost_estimate=cost,
        )(x, w_col, b_smem)
        return out

    # ---- generic O > 1 path: pad output channels to a lane-dense width ------
    Opad = _round_up(O, 128)
    if Opad != O:
        w_p = jnp.pad(w_t, ((0, 0), (0, Opad - O)))  # tiny (C, Opad) pad, done once
        b_p = jnp.pad(b, ((0, 0), (0, Opad - O)))
    else:
        w_p, b_p = w_t, b

    cparams = pltpu.CompilerParams(
        dimension_semantics=("parallel",),
        vmem_limit_bytes=_vmem_limit_bytes(block_b, C, Opad),
    )
    out = pl.pallas_call(
        _value_head_kernel,
        out_shape=jax.ShapeDtypeStruct((B, Opad), jnp.float32),
        grid=grid,
        in_specs=[
            pl.BlockSpec((block_b, C), lambda i: (i, 0)),              # x tiles
            pl.BlockSpec((C, Opad), lambda i: (0, 0)),                 # weights (resident)
            pl.BlockSpec((1, Opad), lambda i: (0, 0)),                 # bias (resident)
        ],
        out_specs=pl.BlockSpec((block_b, Opad), lambda i: (i, 0)),
        compiler_params=cparams,
        cost_estimate=cost,
    )(x, w_p, b_p)

    if Opad != O:
        out = out[:, :O]
    return out


def init_value_head_params(key, in_channels, out_channels=1):
    """Deterministic init mimicking nn.Linear default (uniform +-1/sqrt(fan_in))."""
    kw, kb = jax.random.split(key)
    bound = 1.0 / (in_channels ** 0.5)
    # PyTorch weight is (out_channels, in_channels); keep transposed (C, O) layout.
    w_t = jax.random.uniform(
        kw, (in_channels, out_channels), jnp.float32, minval=-bound, maxval=bound
    )
    b = jax.random.uniform(
        kb, (1, out_channels), jnp.float32, minval=-bound, maxval=bound
    )
    return w_t, b


if __name__ == "__main__":
    key = jax.random.PRNGKey(0)

    # --- test 1: canonical module use (FC 32 -> 1, tanh), tiny batch ---------
    k_x, k_p, key = jax.random.split(key, 3)
    batch, in_channels, out_channels = 8, 32, 1
    x = jax.random.normal(k_x, (batch, in_channels), jnp.float32)
    w_t, b = init_value_head_params(k_p, in_channels, out_channels)
    out = jax.block_until_ready(value_head_forward(x, w_t, b))
    ref = jnp.tanh(x @ w_t + b)
    assert out.shape == (batch, out_channels)
    assert jnp.allclose(out, ref, atol=1e-4, rtol=1e-4)

    # --- test 2: AlphaZero value head FC 256 -> 1, ragged multi-tile batch ---
    # (exercises the no-pad partial tail block: grid = ceil(300/128) = 3)
    k_x, k_p, key = jax.random.split(key, 3)
    batch2, in_channels2 = 300, 256
    x2 = jax.random.normal(k_x, (batch2, in_channels2), jnp.float32)
    w2, b2 = init_value_head_params(k_p, in_channels2, 1)
    out2 = jax.block_until_ready(value_head_forward(x2, w2, b2, block_b=128))
    ref2 = jnp.tanh(x2 @ w2 + b2)
    assert out2.shape == (batch2, 1)
    assert jnp.allclose(out2, ref2, atol=1e-4, rtol=1e-4)

    # --- test 2b: default (auto) tile choice on the same shape ---------------
    out2b = jax.block_until_ready(value_head_forward(x2, w2, b2))
    assert jnp.allclose(out2b, ref2, atol=1e-4, rtol=1e-4)

    # --- test 3: generic out_channels > 1 path (lane-dense padded MXU) -------
    k_x, k_p, key = jax.random.split(key, 3)
    batch3, in_channels3, out_channels3 = 16, 64, 4
    x3 = jax.random.normal(k_x, (batch3, in_channels3), jnp.float32)
    w3, b3 = init_value_head_params(k_p, in_channels3, out_channels3)
    out3 = jax.block_until_ready(value_head_forward(x3, w3, b3))
    ref3 = jnp.tanh(x3 @ w3 + b3)
    assert out3.shape == (batch3, out_channels3)
    assert jnp.allclose(out3, ref3, atol=1e-4, rtol=1e-4)

    print("KERNEL_OK")
</pallas_src>

<mosaic_0001>
module attributes {stable_mosaic.version = 11 : i64} {
  func.func @_value_head_o1_kernel(%arg0: i32, %arg1: memref<8x32xf32, #tpu.memory_space<vmem>>, %arg2: memref<32x1xf32, #tpu.memory_space<vmem>>, %arg3: memref<1x1xf32, #tpu.memory_space<smem>>, %arg4: memref<8x1xf32, #tpu.memory_space<vmem>>) attributes {dimension_semantics = [#tpu.dimension_semantics<parallel>], iteration_bounds = array<i64: 1>, scalar_prefetch = 0 : i64, scratch_operands = 0 : i64, tpu.core_type = #tpu.core_type<tc>, window_params = [{transform_indices = @transform_0, window_bounds = array<i64: 8, 32>}, {pipeline_mode = #tpu.pipeline_mode<synchronous>, transform_indices = @transform_1, window_bounds = array<i64: 32, 1>}, {transform_indices = @transform_2, window_bounds = array<i64: 1, 1>}, {transform_indices = @transform_3, window_bounds = array<i64: 8, 1>}]} {
    %c0 = arith.constant 0 : index
    %c0_0 = arith.constant 0 : index
    %0 = vector.load %arg1[%c0, %c0_0] : memref<8x32xf32, #tpu.memory_space<vmem>>, vector<8x32xf32>
    %c0_1 = arith.constant 0 : index
    %c0_2 = arith.constant 0 : index
    %1 = vector.load %arg2[%c0_1, %c0_2] : memref<32x1xf32, #tpu.memory_space<vmem>>, vector<32x1xf32>
    %cst = arith.constant dense<0.000000e+00> : vector<8x1xf32>
    %2 = tpu.matmul %0, %1, %cst {dimension_numbers = #tpu.dot_dimension_numbers<[1], [0], [0], [1], [0, 0, 1, 1], [], []>} : vector<8x32xf32>, vector<32x1xf32>, vector<8x1xf32> -> vector<8x1xf32>
    %c0_3 = arith.constant 0 : index
    %c0_4 = arith.constant 0 : index
    %3 = memref.load %arg3[%c0_3, %c0_4] : memref<1x1xf32, #tpu.memory_space<smem>>
    %4 = vector.broadcast %3 : f32 to vector<8x1xf32>
    %5 = arith.addf %2, %4 : vector<8x1xf32>
    %6 = math.tanh %5 : vector<8x1xf32>
    %c0_5 = arith.constant 0 : index
    %c0_6 = arith.constant 0 : index
    %7 = vector.load %arg4[%c0_5, %c0_6] : memref<8x1xf32, #tpu.memory_space<vmem>>, vector<8x1xf32>
    tpu.vector_store %arg4[%c0_5, %c0_6], %6 {strides = array<i32>} : memref<8x1xf32, #tpu.memory_space<vmem>>, vector<8x1xf32>,
    return
  }
  func.func @transform_0(%arg0: i32) -> (i32, i32) {
    %c0_i32 = arith.constant 0 : i32
    %c0_i32_0 = arith.constant 0 : i32
    return %arg0, %c0_i32 : i32, i32
  }
  func.func @transform_1(%arg0: i32) -> (i32, i32) {
    %c0_i32 = arith.constant 0 : i32
    %c0_i32_0 = arith.constant 0 : i32
    %c0_i32_1 = arith.constant 0 : i32
    return %c0_i32, %c0_i32_0 : i32, i32
  }
  func.func @transform_2(%arg0: i32) -> (i32, i32) {
    %c0_i32 = arith.constant 0 : i32
    %c0_i32_0 = arith.constant 0 : i32
    %c0_i32_1 = arith.constant 0 : i32
    return %c0_i32, %c0_i32_0 : i32, i32
  }
  func.func @transform_3(%arg0: i32) -> (i32, i32) {
    %c0_i32 = arith.constant 0 : i32
    %c0_i32_0 = arith.constant 0 : i32
    return %arg0, %c0_i32 : i32, i32
  }
}

</mosaic_0001>

<bundles_post_ra>
// kernel: tpu_custom_call.1
= control target key start
LH: loop header
LB: loop body
LE: loop exit
PB: predicated region body
PF: predicated region fallthrough
CT: control target
= control target key end

     0   :  { %vm22_vm0 = vcmask 261120   ;;  %vm47_vm1 = vcmask 7168   ;;  %s97_s1 = inlined_call_operand.vmem [shape: f32[32,1], index: 1, kind: input, shape index: {}]   ;;  %s98_s0 = inlined_call_operand.vmem [shape: f32[8,32], index: 0, kind: input, shape index: {}]   ;;  %s99_s2 = inlined_call_operand.<no memory space> [shape: f32[1,1], index: 2, kind: input, shape index: {}]   ;;  %s100_s3 = inlined_call_operand.vmem [shape: f32[8,1], index: 3, kind: output, shape index: {}]  }
   0x1   :  { %v19_v0 = vld [vmem:[%s97_s1 + $0x18] sm:$0xff]  ;;  %v18_v1 = vld [vmem:[%s97_s1 + $0x10] sm:$0xff]  ;;  %v17_v2 = vld [vmem:[%s97_s1 + $0x8] sm:$0xff]  ;;  %v21_v5 = vstv %s99_s2 }
   0x2   :  { %38 = vmatpush.msra.mxu0 %v19_v0  ;;  %v16_v3 = vld [vmem:[%s97_s1] sm:$0xff] }
   0x3   :  { %v15_v4 = vld [vmem:[%s98_s0] sm:$0xff] }
   0x4   :  { %39 = vmatpush.msra.mxu0 %v18_v1 }
   0x6   :  { %40 = vmatpush.msra.mxu0 %v17_v2 }
   0x8   :  { %41 = vmatpush.msra.mxu0 %v16_v3 }
   0x9   :  { %53 = vmatmul.msk.f32.vlgmr.msra.gmra.mxu0 %vm22_vm0, %v15_v4 }
  0x86   :  { %v43_v6 = vpop.f32.mrf.mxu0 }
  0x87   :  { %v44_v7 = vadd.f32 %v43_v6, %v21_v5 }
  0x89   :  { %54 = vtanh.f32 %v44_v7 }
  0x8f   :  { %v55_v8 = vpop.eup %54 }
  0x90   :  { %48 = vst.msk [vmem:[%s100_s3] sm:$0xff] %vm47_vm1, %v55_v8 }

</bundles_post_ra>
